<compile_context>
chip_gen: v7x
topology: tpu7x:2x2x1
jax: 0.10.0
libtpu: 0.0.40
codegen_flags: <defaults>
</compile_context>

<pallas_src>
import jax
import jax.numpy as jnp
from jax.experimental import pallas as pl
from jax.experimental.pallas import tpu as pltpu

DIM_ACTION = 18
DIM_BODY = 70
DIM_EX = 250
OFFSET_EX = DIM_BODY + DIM_EX  # 320

H1, H2, H3, H4 = 256, 128, 128, 128
EPS = 1e-6
NEG_SLOPE = 0.2

VEC_ROWS = 16   # packed bias/gamma/beta slab rows (padded to sublane multiple)
VEC_COLS = H1   # 256 lanes


def _leaky_relu(x):
    # mul + max (2 VALU ops) instead of cmp + mul + select.
    return jnp.maximum(x, NEG_SLOPE * x)


def _layer_norm(x, gamma, beta, n_features):
    # PyTorch x.std(-1) is the unbiased (N-1) sample std; eps added to the std.
    mean = jnp.mean(x, axis=-1, keepdims=True)
    c = x - mean
    var = jnp.sum(c * c, axis=-1, keepdims=True) * (1.0 / (n_features - 1))
    std = jnp.sqrt(var)
    # Reciprocal of the (B,1) denom on the EUP, then a broadcast multiply,
    # instead of dividing the whole (B,H) tensor on the VPU chain.
    inv = pl.reciprocal(std + EPS, approx=True)
    return gamma * (c * inv) + beta


def critic_kernel(obs_ref, act_ref,
                  w1_ref, w2a_ref, w2b_ref, w3_ref, w4_ref, w5_ref,
                  vec_ref, out_ref):
    obs = obs_ref[...]          # (B, obs_width)  (trailing cols hit zero rows of w1)
    act = act_ref[...]          # (B, 18)

    # Packed small vectors — static Ref slices are cheap.
    b1, g1, be1 = vec_ref[0:1, :H1], vec_ref[1:2, :H1], vec_ref[2:3, :H1]
    b2, g2, be2 = vec_ref[3:4, :H2], vec_ref[4:5, :H2], vec_ref[5:6, :H2]
    b3, g3, be3 = vec_ref[6:7, :H3], vec_ref[7:8, :H3], vec_ref[8:9, :H3]
    b4, g4, be4 = vec_ref[9:10, :H4], vec_ref[10:11, :H4], vec_ref[11:12, :H4]
    b5 = vec_ref[12:13, 0:1]

    # hidden1 + leaky_relu + ln1   (obs slice folded into zero-padded w1)
    x = jnp.dot(obs, w1_ref[...], preferred_element_type=jnp.float32) + b1
    x = _layer_norm(_leaky_relu(x), g1, be1, H1)

    # cat([x, act]) -> hidden2, rewritten as exact split matmul
    x = (jnp.dot(x, w2a_ref[...], preferred_element_type=jnp.float32)
         + jnp.dot(act, w2b_ref[...], preferred_element_type=jnp.float32)
         + b2)
    x = _layer_norm(_leaky_relu(x), g2, be2, H2)

    # hidden3 + leaky_relu + ln3
    x = jnp.dot(x, w3_ref[...], preferred_element_type=jnp.float32) + b3
    x = _layer_norm(_leaky_relu(x), g3, be3, H3)

    # hidden4 + leaky_relu + ln4
    x = jnp.dot(x, w4_ref[...], preferred_element_type=jnp.float32) + b4
    x = _layer_norm(_leaky_relu(x), g4, be4, H4)

    # hidden5 (128 -> 1)
    out_ref[...] = jnp.dot(x, w5_ref[...], preferred_element_type=jnp.float32) + b5


def critic_forward(obs, act, prep):
    """obs: (B, obs_width >= 320) f32, act: (B, 18) f32 -> (B, 1) f32."""
    B = obs.shape[0]
    operands = (obs, act,
                prep["w1"], prep["w2a"], prep["w2b"],
                prep["w3"], prep["w4"], prep["w5"],
                prep["vec"])
    vmem = pl.BlockSpec(memory_space=pltpu.VMEM)
    # Grid-less: total footprint < 1 MiB, everything fits VMEM with no tiling.
    return pl.pallas_call(
        critic_kernel,
        out_shape=jax.ShapeDtypeStruct((B, 1), jnp.float32),
        in_specs=[vmem] * len(operands),
        out_specs=vmem,
    )(*operands)


def init_params(key):
    """Raw params mirroring the PyTorch module's shapes."""
    ks = jax.random.split(key, 5)

    def lin(k, fan_in, fan_out):
        bound = 1.0 / jnp.sqrt(fan_in)
        kw, kb = jax.random.split(k)
        w = jax.random.uniform(kw, (fan_in, fan_out), jnp.float32, -bound, bound)
        b = jax.random.uniform(kb, (fan_out,), jnp.float32, -bound, bound)
        return w, b

    w1, b1 = lin(ks[0], OFFSET_EX, H1)                 # hidden1: 320 -> 256
    w2, b2 = lin(ks[1], H1 + DIM_ACTION, H2)           # hidden2: 274 -> 128
    w3, b3 = lin(ks[2], H2, H3)
    w4, b4 = lin(ks[3], H3, H4)
    w5, b5 = lin(ks[4], H4, 1)

    return {
        "w1": w1, "b1": b1, "g1": jnp.ones((H1,), jnp.float32), "be1": jnp.zeros((H1,), jnp.float32),
        "w2": w2, "b2": b2, "g2": jnp.ones((H2,), jnp.float32), "be2": jnp.zeros((H2,), jnp.float32),
        "w3": w3, "b3": b3, "g3": jnp.ones((H3,), jnp.float32), "be3": jnp.zeros((H3,), jnp.float32),
        "w4": w4, "b4": b4, "g4": jnp.ones((H4,), jnp.float32), "be4": jnp.zeros((H4,), jnp.float32),
        "w5": w5, "b5": b5,
    }


def prepare_params(p, obs_width):
    """One-time packing: pad w1 to full obs width, split w2, pack small vectors."""
    assert obs_width >= OFFSET_EX
    # Zero rows for the trailing (ignored) obs features -> exact equivalent of
    # the obs[:, :OFFSET_EX] slice, done for free on the MXU.
    w1_full = jnp.zeros((obs_width, H1), jnp.float32).at[:OFFSET_EX, :].set(p["w1"])

    vec = jnp.zeros((VEC_ROWS, VEC_COLS), jnp.float32)
    vec = vec.at[0, :H1].set(p["b1"]).at[1, :H1].set(p["g1"]).at[2, :H1].set(p["be1"])
    vec = vec.at[3, :H2].set(p["b2"]).at[4, :H2].set(p["g2"]).at[5, :H2].set(p["be2"])
    vec = vec.at[6, :H3].set(p["b3"]).at[7, :H3].set(p["g3"]).at[8, :H3].set(p["be3"])
    vec = vec.at[9, :H4].set(p["b4"]).at[10, :H4].set(p["g4"]).at[11, :H4].set(p["be4"])
    vec = vec.at[12, 0].set(p["b5"][0])

    return {
        "w1": w1_full,
        "w2a": p["w2"][:H1],          # x-part of cat([x, act]) weight
        "w2b": p["w2"][H1:],          # act-part
        "w3": p["w3"], "w4": p["w4"], "w5": p["w5"],
        "vec": vec,
    }


def _reference(obs, act, p):
    """Pure-JAX reference of the PyTorch forward (exact divide LayerNorm)."""
    obs = obs[:, :OFFSET_EX]

    def ln(x, g, b, n):
        m = jnp.mean(x, -1, keepdims=True)
        c = x - m
        std = jnp.sqrt(jnp.sum(c * c, -1, keepdims=True) / (n - 1))
        return g * c / (std + EPS) + b

    x = _leaky_relu(obs @ p["w1"] + p["b1"])
    x = ln(x, p["g1"], p["be1"], H1)
    x = jnp.concatenate([x, act], axis=1)
    x = _leaky_relu(x @ p["w2"] + p["b2"])
    x = ln(x, p["g2"], p["be2"], H2)
    x = _leaky_relu(x @ p["w3"] + p["b3"])
    x = ln(x, p["g3"], p["be3"], H3)
    x = _leaky_relu(x @ p["w4"] + p["b4"])
    x = ln(x, p["g4"], p["be4"], H4)
    return x @ p["w5"] + p["b5"]


if __name__ == "__main__":
    key = jax.random.PRNGKey(0)
    kp, ko, ka = jax.random.split(key, 3)

    B = 8
    OBS_TOTAL = OFFSET_EX + 16  # obs carries extra trailing features (zeroed via padded w1)
    obs = jax.random.normal(ko, (B, OBS_TOTAL), jnp.float32)
    act = jax.random.normal(ka, (B, DIM_ACTION), jnp.float32)

    params = init_params(kp)
    prep = prepare_params(params, OBS_TOTAL)   # one-time padding/packing, not per call

    fwd = jax.jit(critic_forward)
    out = jax.block_until_ready(fwd(obs, act, prep))

    ref = _reference(obs, act, params)
    assert out.shape == (B, 1)
    # approx EUP reciprocal in LayerNorm has ~2^-12 relative error, so the
    # tolerance is relaxed from 1e-4 accordingly; semantics are otherwise exact.
    assert jnp.allclose(out, ref, atol=2e-3, rtol=2e-3), "mismatch vs reference"
    print("KERNEL_OK")
</pallas_src>

<mosaic_0001>
module attributes {stable_mosaic.version = 11 : i64} {
  func.func @critic_kernel(%arg0: memref<8x336xf32, #tpu.memory_space<vmem>>, %arg1: memref<8x18xf32, #tpu.memory_space<vmem>>, %arg2: memref<336x256xf32, #tpu.memory_space<vmem>>, %arg3: memref<256x128xf32, #tpu.memory_space<vmem>>, %arg4: memref<18x128xf32, #tpu.memory_space<vmem>>, %arg5: memref<128x128xf32, #tpu.memory_space<vmem>>, %arg6: memref<128x128xf32, #tpu.memory_space<vmem>>, %arg7: memref<128x1xf32, #tpu.memory_space<vmem>>, %arg8: memref<16x256xf32, #tpu.memory_space<vmem>>, %arg9: memref<8x1xf32, #tpu.memory_space<vmem>>) attributes {dimension_semantics = [], scalar_prefetch = 0 : i64, scratch_operands = 0 : i64, tpu.core_type = #tpu.core_type<tc>} {
    %c0 = arith.constant 0 : index
    %c0_0 = arith.constant 0 : index
    %0 = vector.load %arg0[%c0, %c0_0] : memref<8x336xf32, #tpu.memory_space<vmem>>, vector<8x336xf32>
    %c0_1 = arith.constant 0 : index
    %c0_2 = arith.constant 0 : index
    %1 = vector.load %arg1[%c0_1, %c0_2] : memref<8x18xf32, #tpu.memory_space<vmem>>, vector<8x18xf32>
    %c0_3 = arith.constant 0 : index
    %c0_4 = arith.constant 0 : index
    %2 = vector.load %arg8[%c0_3, %c0_4] : memref<16x256xf32, #tpu.memory_space<vmem>>, vector<1x256xf32>
    %c1 = arith.constant 1 : index
    %c0_5 = arith.constant 0 : index
    %3 = vector.load %arg8[%c1, %c0_5] : memref<16x256xf32, #tpu.memory_space<vmem>>, vector<1x256xf32>
    %c2 = arith.constant 2 : index
    %c0_6 = arith.constant 0 : index
    %4 = vector.load %arg8[%c2, %c0_6] : memref<16x256xf32, #tpu.memory_space<vmem>>, vector<1x256xf32>
    %c3 = arith.constant 3 : index
    %c0_7 = arith.constant 0 : index
    %5 = vector.load %arg8[%c3, %c0_7] : memref<16x256xf32, #tpu.memory_space<vmem>>, vector<1x128xf32>
    %c4 = arith.constant 4 : index
    %c0_8 = arith.constant 0 : index
    %6 = vector.load %arg8[%c4, %c0_8] : memref<16x256xf32, #tpu.memory_space<vmem>>, vector<1x128xf32>
    %c5 = arith.constant 5 : index
    %c0_9 = arith.constant 0 : index
    %7 = vector.load %arg8[%c5, %c0_9] : memref<16x256xf32, #tpu.memory_space<vmem>>, vector<1x128xf32>
    %c6 = arith.constant 6 : index
    %c0_10 = arith.constant 0 : index
    %8 = vector.load %arg8[%c6, %c0_10] : memref<16x256xf32, #tpu.memory_space<vmem>>, vector<1x128xf32>
    %c7 = arith.constant 7 : index
    %c0_11 = arith.constant 0 : index
    %9 = vector.load %arg8[%c7, %c0_11] : memref<16x256xf32, #tpu.memory_space<vmem>>, vector<1x128xf32>
    %c8 = arith.constant 8 : index
    %c0_12 = arith.constant 0 : index
    %10 = vector.load %arg8[%c8, %c0_12] : memref<16x256xf32, #tpu.memory_space<vmem>>, vector<1x128xf32>
    %c9 = arith.constant 9 : index
    %c0_13 = arith.constant 0 : index
    %11 = vector.load %arg8[%c9, %c0_13] : memref<16x256xf32, #tpu.memory_space<vmem>>, vector<1x128xf32>
    %c10 = arith.constant 10 : index
    %c0_14 = arith.constant 0 : index
    %12 = vector.load %arg8[%c10, %c0_14] : memref<16x256xf32, #tpu.memory_space<vmem>>, vector<1x128xf32>
    %c11 = arith.constant 11 : index
    %c0_15 = arith.constant 0 : index
    %13 = vector.load %arg8[%c11, %c0_15] : memref<16x256xf32, #tpu.memory_space<vmem>>, vector<1x128xf32>
    %c12 = arith.constant 12 : index
    %c0_16 = arith.constant 0 : index
    %14 = vector.load %arg8[%c12, %c0_16] : memref<16x256xf32, #tpu.memory_space<vmem>>, vector<1x1xf32>
    %c0_17 = arith.constant 0 : index
    %c0_18 = arith.constant 0 : index
    %15 = vector.load %arg2[%c0_17, %c0_18] : memref<336x256xf32, #tpu.memory_space<vmem>>, vector<336x256xf32>
    %cst = arith.constant dense<0.000000e+00> : vector<8x256xf32>
    %16 = tpu.matmul %0, %15, %cst {dimension_numbers = #tpu.dot_dimension_numbers<[1], [0], [0], [1], [0, 0, 1, 1], [], []>} : vector<8x336xf32>, vector<336x256xf32>, vector<8x256xf32> -> vector<8x256xf32>
    %17 = vector.broadcast %2 : vector<1x256xf32> to vector<8x256xf32>
    %18 = arith.addf %16, %17 : vector<8x256xf32>
    %cst_19 = arith.constant 2.000000e-01 : f32
    %19 = vector.broadcast %cst_19 : f32 to vector<8x256xf32>
    %20 = arith.mulf %19, %18 : vector<8x256xf32>
    %21 = arith.maximumf %18, %20 : vector<8x256xf32>
    %cst_20 = arith.constant dense<0.000000e+00> : vector<8xf32>
    %22 = vector.multi_reduction <add>, %21, %cst_20 [1] : vector<8x256xf32> to vector<8xf32>
    %23 = vector.shape_cast %22 : vector<8xf32> to vector<8x1xf32>
    %cst_21 = arith.constant 2.560000e+02 : f32
    %24 = vector.broadcast %cst_21 : f32 to vector<8x1xf32>
    %25 = arith.divf %23, %24 : vector<8x1xf32>
    %26 = vector.broadcast %25 : vector<8x1xf32> to vector<8x256xf32>
    %27 = arith.subf %21, %26 : vector<8x256xf32>
    %28 = arith.mulf %27, %27 : vector<8x256xf32>
    %cst_22 = arith.constant dense<0.000000e+00> : vector<8xf32>
    %29 = vector.multi_reduction <add>, %28, %cst_22 [1] : vector<8x256xf32> to vector<8xf32>
    %30 = vector.shape_cast %29 : vector<8xf32> to vector<8x1xf32>
    %cst_23 = arith.constant 0.00392156886 : f32
    %31 = vector.broadcast %cst_23 : f32 to vector<8x1xf32>
    %32 = arith.mulf %30, %31 : vector<8x1xf32>
    %33 = math.sqrt %32 : vector<8x1xf32>
    %cst_24 = arith.constant 9.99999997E-7 : f32
    %34 = vector.broadcast %cst_24 : f32 to vector<8x1xf32>
    %35 = arith.addf %33, %34 : vector<8x1xf32>
    %36 = tpu.reciprocal %35 {approx = true} : vector<8x1xf32> -> vector<8x1xf32>
    %37 = vector.broadcast %36 : vector<8x1xf32> to vector<8x256xf32>
    %38 = arith.mulf %27, %37 : vector<8x256xf32>
    %39 = vector.broadcast %3 : vector<1x256xf32> to vector<8x256xf32>
    %40 = arith.mulf %39, %38 : vector<8x256xf32>
    %41 = vector.broadcast %4 : vector<1x256xf32> to vector<8x256xf32>
    %42 = arith.addf %40, %41 : vector<8x256xf32>
    %c0_25 = arith.constant 0 : index
    %c0_26 = arith.constant 0 : index
    %43 = vector.load %arg3[%c0_25, %c0_26] : memref<256x128xf32, #tpu.memory_space<vmem>>, vector<256x128xf32>
    %cst_27 = arith.constant dense<0.000000e+00> : vector<8x128xf32>
    %44 = tpu.matmul %42, %43, %cst_27 {dimension_numbers = #tpu.dot_dimension_numbers<[1], [0], [0], [1], [0, 0, 1, 1], [], []>} : vector<8x256xf32>, vector<256x128xf32>, vector<8x128xf32> -> vector<8x128xf32>
    %c0_28 = arith.constant 0 : index
    %c0_29 = arith.constant 0 : index
    %45 = vector.load %arg4[%c0_28, %c0_29] : memref<18x128xf32, #tpu.memory_space<vmem>>, vector<18x128xf32>
    %cst_30 = arith.constant dense<0.000000e+00> : vector<8x128xf32>
    %46 = tpu.matmul %1, %45, %cst_30 {dimension_numbers = #tpu.dot_dimension_numbers<[1], [0], [0], [1], [0, 0, 1, 1], [], []>} : vector<8x18xf32>, vector<18x128xf32>, vector<8x128xf32> -> vector<8x128xf32>
    %47 = arith.addf %44, %46 : vector<8x128xf32>
    %48 = vector.broadcast %5 : vector<1x128xf32> to vector<8x128xf32>
    %49 = arith.addf %47, %48 : vector<8x128xf32>
    %cst_31 = arith.constant 2.000000e-01 : f32
    %50 = vector.broadcast %cst_31 : f32 to vector<8x128xf32>
    %51 = arith.mulf %50, %49 : vector<8x128xf32>
    %52 = arith.maximumf %49, %51 : vector<8x128xf32>
    %cst_32 = arith.constant dense<0.000000e+00> : vector<8xf32>
    %53 = vector.multi_reduction <add>, %52, %cst_32 [1] : vector<8x128xf32> to vector<8xf32>
    %54 = vector.shape_cast %53 : vector<8xf32> to vector<8x1xf32>
    %cst_33 = arith.constant 1.280000e+02 : f32
    %55 = vector.broadcast %cst_33 : f32 to vector<8x1xf32>
    %56 = arith.divf %54, %55 : vector<8x1xf32>
    %57 = vector.broadcast %56 : vector<8x1xf32> to vector<8x128xf32>
    %58 = arith.subf %52, %57 : vector<8x128xf32>
    %59 = arith.mulf %58, %58 : vector<8x128xf32>
    %cst_34 = arith.constant dense<0.000000e+00> : vector<8xf32>
    %60 = vector.multi_reduction <add>, %59, %cst_34 [1] : vector<8x128xf32> to vector<8xf32>
    %61 = vector.shape_cast %60 : vector<8xf32> to vector<8x1xf32>
    %cst_35 = arith.constant 0.00787401571 : f32
    %62 = vector.broadcast %cst_35 : f32 to vector<8x1xf32>
    %63 = arith.mulf %61, %62 : vector<8x1xf32>
    %64 = math.sqrt %63 : vector<8x1xf32>
    %cst_36 = arith.constant 9.99999997E-7 : f32
    %65 = vector.broadcast %cst_36 : f32 to vector<8x1xf32>
    %66 = arith.addf %64, %65 : vector<8x1xf32>
    %67 = tpu.reciprocal %66 {approx = true} : vector<8x1xf32> -> vector<8x1xf32>
    %68 = vector.broadcast %67 : vector<8x1xf32> to vector<8x128xf32>
    %69 = arith.mulf %58, %68 : vector<8x128xf32>
    %70 = vector.broadcast %6 : vector<1x128xf32> to vector<8x128xf32>
    %71 = arith.mulf %70, %69 : vector<8x128xf32>
    %72 = vector.broadcast %7 : vector<1x128xf32> to vector<8x128xf32>
    %73 = arith.addf %71, %72 : vector<8x128xf32>
    %c0_37 = arith.constant 0 : index
    %c0_38 = arith.constant 0 : index
    %74 = vector.load %arg5[%c0_37, %c0_38] : memref<128x128xf32, #tpu.memory_space<vmem>>, vector<128x128xf32>
    %cst_39 = arith.constant dense<0.000000e+00> : vector<8x128xf32>
    %75 = tpu.matmul %73, %74, %cst_39 {dimension_numbers = #tpu.dot_dimension_numbers<[1], [0], [0], [1], [0, 0, 1, 1], [], []>} : vector<8x128xf32>, vector<128x128xf32>, vector<8x128xf32> -> vector<8x128xf32>
    %76 = vector.broadcast %8 : vector<1x128xf32> to vector<8x128xf32>
    %77 = arith.addf %75, %76 : vector<8x128xf32>
    %cst_40 = arith.constant 2.000000e-01 : f32
    %78 = vector.broadcast %cst_40 : f32 to vector<8x128xf32>
    %79 = arith.mulf %78, %77 : vector<8x128xf32>
    %80 = arith.maximumf %77, %79 : vector<8x128xf32>
    %cst_41 = arith.constant dense<0.000000e+00> : vector<8xf32>
    %81 = vector.multi_reduction <add>, %80, %cst_41 [1] : vector<8x128xf32> to vector<8xf32>
    %82 = vector.shape_cast %81 : vector<8xf32> to vector<8x1xf32>
    %cst_42 = arith.constant 1.280000e+02 : f32
    %83 = vector.broadcast %cst_42 : f32 to vector<8x1xf32>
    %84 = arith.divf %82, %83 : vector<8x1xf32>
    %85 = vector.broadcast %84 : vector<8x1xf32> to vector<8x128xf32>
    %86 = arith.subf %80, %85 : vector<8x128xf32>
    %87 = arith.mulf %86, %86 : vector<8x128xf32>
    %cst_43 = arith.constant dense<0.000000e+00> : vector<8xf32>
    %88 = vector.multi_reduction <add>, %87, %cst_43 [1] : vector<8x128xf32> to vector<8xf32>
    %89 = vector.shape_cast %88 : vector<8xf32> to vector<8x1xf32>
    %cst_44 = arith.constant 0.00787401571 : f32
    %90 = vector.broadcast %cst_44 : f32 to vector<8x1xf32>
    %91 = arith.mulf %89, %90 : vector<8x1xf32>
    %92 = math.sqrt %91 : vector<8x1xf32>
    %cst_45 = arith.constant 9.99999997E-7 : f32
    %93 = vector.broadcast %cst_45 : f32 to vector<8x1xf32>
    %94 = arith.addf %92, %93 : vector<8x1xf32>
    %95 = tpu.reciprocal %94 {approx = true} : vector<8x1xf32> -> vector<8x1xf32>
    %96 = vector.broadcast %95 : vector<8x1xf32> to vector<8x128xf32>
    %97 = arith.mulf %86, %96 : vector<8x128xf32>
    %98 = vector.broadcast %9 : vector<1x128xf32> to vector<8x128xf32>
    %99 = arith.mulf %98, %97 : vector<8x128xf32>
    %100 = vector.broadcast %10 : vector<1x128xf32> to vector<8x128xf32>
    %101 = arith.addf %99, %100 : vector<8x128xf32>
    %c0_46 = arith.constant 0 : index
    %c0_47 = arith.constant 0 : index
    %102 = vector.load %arg6[%c0_46, %c0_47] : memref<128x128xf32, #tpu.memory_space<vmem>>, vector<128x128xf32>
    %cst_48 = arith.constant dense<0.000000e+00> : vector<8x128xf32>
    %103 = tpu.matmul %101, %102, %cst_48 {dimension_numbers = #tpu.dot_dimension_numbers<[1], [0], [0], [1], [0, 0, 1, 1], [], []>} : vector<8x128xf32>, vector<128x128xf32>, vector<8x128xf32> -> vector<8x128xf32>
    %104 = vector.broadcast %11 : vector<1x128xf32> to vector<8x128xf32>
    %105 = arith.addf %103, %104 : vector<8x128xf32>
    %cst_49 = arith.constant 2.000000e-01 : f32
    %106 = vector.broadcast %cst_49 : f32 to vector<8x128xf32>
    %107 = arith.mulf %106, %105 : vector<8x128xf32>
    %108 = arith.maximumf %105, %107 : vector<8x128xf32>
    %cst_50 = arith.constant dense<0.000000e+00> : vector<8xf32>
    %109 = vector.multi_reduction <add>, %108, %cst_50 [1] : vector<8x128xf32> to vector<8xf32>
    %110 = vector.shape_cast %109 : vector<8xf32> to vector<8x1xf32>
    %cst_51 = arith.constant 1.280000e+02 : f32
    %111 = vector.broadcast %cst_51 : f32 to vector<8x1xf32>
    %112 = arith.divf %110, %111 : vector<8x1xf32>
    %113 = vector.broadcast %112 : vector<8x1xf32> to vector<8x128xf32>
    %114 = arith.subf %108, %113 : vector<8x128xf32>
    %115 = arith.mulf %114, %114 : vector<8x128xf32>
    %cst_52 = arith.constant dense<0.000000e+00> : vector<8xf32>
    %116 = vector.multi_reduction <add>, %115, %cst_52 [1] : vector<8x128xf32> to vector<8xf32>
    %117 = vector.shape_cast %116 : vector<8xf32> to vector<8x1xf32>
    %cst_53 = arith.constant 0.00787401571 : f32
    %118 = vector.broadcast %cst_53 : f32 to vector<8x1xf32>
    %119 = arith.mulf %117, %118 : vector<8x1xf32>
    %120 = math.sqrt %119 : vector<8x1xf32>
    %cst_54 = arith.constant 9.99999997E-7 : f32
    %121 = vector.broadcast %cst_54 : f32 to vector<8x1xf32>
    %122 = arith.addf %120, %121 : vector<8x1xf32>
    %123 = tpu.reciprocal %122 {approx = true} : vector<8x1xf32> -> vector<8x1xf32>
    %124 = vector.broadcast %123 : vector<8x1xf32> to vector<8x128xf32>
    %125 = arith.mulf %114, %124 : vector<8x128xf32>
    %126 = vector.broadcast %12 : vector<1x128xf32> to vector<8x128xf32>
    %127 = arith.mulf %126, %125 : vector<8x128xf32>
    %128 = vector.broadcast %13 : vector<1x128xf32> to vector<8x128xf32>
    %129 = arith.addf %127, %128 : vector<8x128xf32>
    %c0_55 = arith.constant 0 : index
    %c0_56 = arith.constant 0 : index
    %130 = vector.load %arg7[%c0_55, %c0_56] : memref<128x1xf32, #tpu.memory_space<vmem>>, vector<128x1xf32>
    %cst_57 = arith.constant dense<0.000000e+00> : vector<8x1xf32>
    %131 = tpu.matmul %129, %130, %cst_57 {dimension_numbers = #tpu.dot_dimension_numbers<[1], [0], [0], [1], [0, 0, 1, 1], [], []>} : vector<8x128xf32>, vector<128x1xf32>, vector<8x1xf32> -> vector<8x1xf32>
    %132 = vector.broadcast %14 : vector<1x1xf32> to vector<8x1xf32>
    %133 = arith.addf %131, %132 : vector<8x1xf32>
    %c0_58 = arith.constant 0 : index
    %c0_59 = arith.constant 0 : index
    %134 = vector.load %arg9[%c0_58, %c0_59] : memref<8x1xf32, #tpu.memory_space<vmem>>, vector<8x1xf32>
    tpu.vector_store %arg9[%c0_58, %c0_59], %133 {strides = array<i32>} : memref<8x1xf32, #tpu.memory_space<vmem>>, vector<8x1xf32>,
    return
  }
}

</mosaic_0001>

<bundles_post_ra>
// kernel: critic_forward.1
= control target key start
LH: loop header
LB: loop body
LE: loop exit
PB: predicated region body
PF: predicated region fallthrough
CT: control target
= control target key end

     0   :  { %14 = vsyncpa [#allocation3], 0  ;;  %s1823_s0 = inlined_call_operand.hbm [shape: f32[8,336], index: 0, kind: input, shape index: {}]   ;;  %s1824_s1 = inlined_call_operand.vmem [shape: f32[8,18], index: 1, kind: input, shape index: {}]   ;;  %s1825_s2 = inlined_call_operand.hbm [shape: f32[336,256], index: 2, kind: input, shape index: {}]   ;;  %s1826_s3 = inlined_call_operand.hbm [shape: f32[256,128], index: 3, kind: input, shape index: {}]   ;;  %s1827_s4 = inlined_call_operand.hbm [shape: f32[18,128], index: 4, kind: input, shape index: {}]   ;;  %s1828_s5 = inlined_call_operand.vmem [shape: f32[128,128], index: 5, kind: input, shape index: {}]   ;;  %s1829_s6 = inlined_call_operand.hbm [shape: f32[128,128], index: 6, kind: input, shape index: {}]   ;;  %s1830_s7 = inlined_call_operand.vmem [shape: f32[128,1], index: 7, kind: input, shape index: {}]   ;;  %s1831_s8 = inlined_call_operand.hbm [shape: f32[16,256], index: 8, kind: input, shape index: {}]   ;;  %s1832_s9 = inlined_call_operand.vmem [shape: f32[8,1], index: 9, kind: output, shape index: {}]  }
   0x1   :  { %15 = vsyncpa [#allocation5], 0 }
   0x2   :  { %16 = vsyncpa [#allocation8], 0 }
   0x3   :  { %17 = vsyncpa [#allocation11], 0  ;;  %s1516_s30 = smov [#allocation4]   ;;  %s1376_s13 = scalar_lea.hbm %s1825_s2, 10752 }
   0x4   :  { %s35_s10 = sshll.u32 %s1516_s30, 4  ;;  %p1377_p0 = scmp.ne.s32.totalorder %s1825_s2, %s1376_s13  ;;  %s36_s10 = int_to_ptr.vmem [resolvable:$true] %s35_s10 }
   0x5   :  { %p1380_p1 = scmp.lt.u32.totalorder %s1376_s13, %s1825_s2 }
   0x7   :  { %p1382_p2 = pnand %p1380_p1, %p1377_p0 }
   0x9   :  { %1385 = shalt.err (!%p1382_p2)
}
   0xa   :  { %s1386_s18 = scalar_lea.vmem %s36_s10, 10752  ;;  %p1391_p4 = scmp.lt.s32.totalorder %s36_s10, %s36_s10 }
   0xb   :  { %p1387_p3 = scmp.ne.s32.totalorder %s36_s10, %s1386_s18  ;;  %p1392_p5 = scmp.lt.s32.totalorder %s1386_s18, %s1386_s18 }
   0xd   :  { %p1393_p6 = por %p1392_p5, %p1391_p4 }
   0xf   :  { %p1394_p7 = pnand %p1393_p6, %p1387_p3 }
  0x11   :  { %1397 = shalt.err (!%p1394_p7)
}
  0x12   :  { %s1517_s19 = smov 256   ;;  %s1518_s20 = smov 16  }
  0x13   :  { %41 = dma.hbm_to_vmem [thread:$0]  %s1825_s2, 10752, %s36_s10, [#allocation5], %s1517_s19, %s1517_s19, %s1518_s20  }
  0x14   :  { %s1519_s23 = smov [#allocation7]   ;;  %s1520_s25 = smov [#allocation2]  }
  0x15   :  { %s59_s24 = sshll.u32 %s1519_s23, 4  ;;  %s24_s26 = sshll.u32 %s1520_s25, 4  ;;  %s60_s24 = int_to_ptr.vmem [resolvable:$true] %s59_s24  ;;  %s25_s26 = int_to_ptr.vmem [resolvable:$true] %s24_s26 }
  0x16   :  { %s1398_s29 = scalar_lea.hbm %s1827_s4, 384 }
  0x17   :  { %p1399_p8 = scmp.ne.s32.totalorder %s1827_s4, %s1398_s29  ;;  %p1402_p9 = scmp.lt.u32.totalorder %s1398_s29, %s1827_s4 }
  0x19   :  { %p1404_p10 = pnand %p1402_p9, %p1399_p8 }
  0x1b   :  { %1407 = shalt.err (!%p1404_p10)
}
  0x1c   :  { %s1408_s2 = scalar_lea.vmem %s60_s24, 384  ;;  %p1413_p12 = scmp.lt.s32.totalorder %s60_s24, %s60_s24 }
  0x1d   :  { %p1409_p11 = scmp.ne.s32.totalorder %s60_s24, %s1408_s2  ;;  %p1414_p13 = scmp.lt.s32.totalorder %s1408_s2, %s1408_s2 }
  0x1f   :  { %p1415_p0 = por %p1414_p13, %p1413_p12 }
  0x21   :  { %p1416_p1 = pnand %p1415_p0, %p1409_p11 }
  0x23   :  { %1419 = shalt.err (!%p1416_p1)
}
  0x24   :  { %s1521_s10 = smov 128   ;;  %s1522_s14 = smov 8  }
  0x25   :  { %65 = dma.hbm_to_vmem [thread:$0]  %s1827_s4, 384, %s60_s24, [#allocation8], %s1521_s10, %s1521_s10, %s1522_s14  }
  0x26   :  { %s1420_s21 = scalar_lea.hbm %s1823_s0, 384 }
  0x27   :  { %p1421_p2 = scmp.ne.s32.totalorder %s1823_s0, %s1420_s21  ;;  %p1424_p3 = scmp.lt.u32.totalorder %s1420_s21, %s1823_s0 }
  0x29   :  { %p1426_p4 = pnand %p1424_p3, %p1421_p2 }
  0x2b   :  { %1429 = shalt.err (!%p1426_p4)
}
  0x2c   :  { %s1430_s28 = scalar_lea.vmem %s25_s26, 384  ;;  %p1435_p6 = scmp.lt.s32.totalorder %s25_s26, %s25_s26 }
  0x2d   :  { %p1431_p5 = scmp.ne.s32.totalorder %s25_s26, %s1430_s28  ;;  %p1436_p7 = scmp.lt.s32.totalorder %s1430_s28, %s1430_s28 }
  0x2f   :  { %p1437_p8 = por %p1436_p7, %p1435_p6 }
  0x31   :  { %p1438_p9 = pnand %p1437_p8, %p1431_p5 }
  0x33   :  { %1441 = shalt.err (!%p1438_p9)
}
  0x34   :  { %27 = dma.hbm_to_vmem [thread:$0]  %s1823_s0, 384, %s25_s26, [#allocation3]  }
  0x35   :  { %s1523_s29 = smov [#allocation6]   ;;  %s1524_s11 = smov [#allocation9]  }
  0x36   :  { %s47_s30 = sshll.u32 %s1523_s29, 4  ;;  %s73_s12 = sshll.u32 %s1524_s11, 4  ;;  %s48_s30 = int_to_ptr.vmem [resolvable:$true] %s47_s30  ;;  %s74_s12 = int_to_ptr.vmem [resolvable:$true] %s73_s12 }
  0x37   :  { %s1442_s15 = scalar_lea.hbm %s1826_s3, 4096 }
  0x38   :  { %p1443_p10 = scmp.ne.s32.totalorder %s1826_s3, %s1442_s15  ;;  %p1446_p11 = scmp.lt.u32.totalorder %s1442_s15, %s1826_s3 }
  0x3a   :  { %p1448_p12 = pnand %p1446_p11, %p1443_p10 }
  0x3c   :  { %1451 = shalt.err (!%p1448_p12)
}
  0x3d   :  { %s1452_s0 = scalar_lea.vmem %s48_s30, 4096  ;;  %p1457_p0 = scmp.lt.s32.totalorder %s48_s30, %s48_s30 }
  0x3e   :  { %p1453_p13 = scmp.ne.s32.totalorder %s48_s30, %s1452_s0  ;;  %p1458_p1 = scmp.lt.s32.totalorder %s1452_s0, %s1452_s0 }
  0x40   :  { %p1459_p2 = por %p1458_p1, %p1457_p0 }
  0x42   :  { %p1460_p3 = pnand %p1459_p2, %p1453_p13 }
  0x44   :  { %1463 = shalt.err (!%p1460_p3)
}
  0x45   :  { %53 = dma.hbm_to_vmem [thread:$0]  %s1826_s3, 4096, %s48_s30, [#allocation5], %s1521_s10, %s1521_s10, %s1522_s14  }
  0x46   :  { %s1464_s27 = scalar_lea.hbm %s1829_s6, 2048 }
  0x47   :  { %p1465_p4 = scmp.ne.s32.totalorder %s1829_s6, %s1464_s27  ;;  %p1468_p5 = scmp.lt.u32.totalorder %s1464_s27, %s1829_s6 }
  0x49   :  { %p1470_p6 = pnand %p1468_p5, %p1465_p4 }
  0x4b   :  { %1473 = shalt.err (!%p1470_p6)
}
  0x4c   :  { %s1474_s11 = scalar_lea.vmem %s74_s12, 2048  ;;  %p1479_p8 = scmp.lt.s32.totalorder %s74_s12, %s74_s12 }
  0x4d   :  { %p1475_p7 = scmp.ne.s32.totalorder %s74_s12, %s1474_s11  ;;  %p1480_p9 = scmp.lt.s32.totalorder %s1474_s11, %s1474_s11 }
  0x4f   :  { %p1481_p10 = por %p1480_p9, %p1479_p8 }
  0x51   :  { %p1482_p11 = pnand %p1481_p10, %p1475_p7 }
  0x53   :  { %1485 = shalt.err (!%p1482_p11)
}
  0x54   :  { %79 = dma.hbm_to_vmem [thread:$0]  %s1829_s6, 2048, %s74_s12, [#allocation8], %s1521_s10, %s1521_s10, %s1522_s14  }
  0x55   :  { %s1525_s13 = smov [#allocation10]   ;;  %s1486_s17 = scalar_lea.hbm %s1831_s8, 512 }
  0x56   :  { %s87_s2 = sshll.u32 %s1525_s13, 4  ;;  %p1487_p12 = scmp.ne.s32.totalorder %s1831_s8, %s1486_s17  ;;  %s88_s2 = int_to_ptr.vmem [resolvable:$true] %s87_s2 }
  0x57   :  { %p1490_p13 = scmp.lt.u32.totalorder %s1486_s17, %s1831_s8 }
  0x59   :  { %p1492_p0 = pnand %p1490_p13, %p1487_p12 }
  0x5b   :  { %1495 = shalt.err (!%p1492_p0)
}
  0x5c   :  { %s1496_s22 = scalar_lea.vmem %s88_s2, 512  ;;  %p1501_p2 = scmp.lt.s32.totalorder %s88_s2, %s88_s2 }
  0x5d   :  { %p1497_p1 = scmp.ne.s32.totalorder %s88_s2, %s1496_s22  ;;  %p1502_p3 = scmp.lt.s32.totalorder %s1496_s22, %s1496_s22 }
  0x5f   :  { %p1503_p4 = por %p1502_p3, %p1501_p2 }
  0x61   :  { %p1504_p5 = pnand %p1503_p4, %p1497_p1 }
  0x63   :  { %1507 = shalt.err (!%p1504_p5)
}
  0x64   :  { %93 = dma.hbm_to_vmem [thread:$0]  %s1831_s8, 512, %s88_s2, [#allocation11], %s1517_s19, %s1517_s19, %s1518_s20  }
  0x65   :  { %1508 = dma.done.wait [#allocation3], 384  }
  0x66   :  { %1509 = vsyncadd [#allocation3], 4294966912 }
  0x67   :  { %1510 = dma.done.wait [#allocation5], 14848  }
  0x68   :  { %1511 = vsyncadd [#allocation5], 4294952448 }
  0x69   :  { %1512 = dma.done.wait [#allocation8], 2432  }
  0x6a   :  { %1513 = vsyncadd [#allocation8], 4294964864 }
  0x6b   :  { %1514 = dma.done.wait [#allocation11], 512  }
  0x6c   :  { %1515 = vsyncadd [#allocation11], 4294966784  ;;  %v132_v0 = vld [vmem:[#allocation4 + $0x8] sm:$0xff]  ;;  %v134_v1 = vld [vmem:[#allocation4 + $0x18] sm:$0xff]  ;;  %vm226_vm0 = vcmask 654336   ;;  %vm465_vm1 = vcmask 1041408  }
  0x6d   :  { %v131_v2 = vld [vmem:[#allocation4] sm:$0xff]  ;;  %v1152_v3 = vpack.c.bf16 %v134_v1, %v132_v0  ;;  %v133_v4 = vld [vmem:[#allocation4 + $0x10] sm:$0xff]  ;;  %v136_v5 = vld [vmem:[#allocation4 + $0x28] sm:$0xff]  ;;  %vm1528_vm2 = vmmov 0   ;;  %vm461_vm3 = vcmask 146432   ;;  %vm935_vm12 = vcmask 7168  }
  0x6e   :  { %v138_v6 = vld [vmem:[#allocation4 + $0x38] sm:$0xff]  ;;  %v1154_v7 = vpack.c.bf16 %v133_v4, %v131_v2  ;;  %v135_v9 = vld [vmem:[#allocation4 + $0x20] sm:$0xff]  ;;  %v137_v10 = vld [vmem:[#allocation4 + $0x30] sm:$0xff] }
  0x6f   :  { %v1156_v8 = vpack.c.bf16 %v138_v6, %v136_v5  ;;  %v140_v11 = vld [vmem:[#allocation4 + $0x48] sm:$0xff]  ;;  %1153 = vmatprep.subr.bf16.mxu0 %v1152_v3  ;;  %v142_v12 = vld [vmem:[#allocation4 + $0x58] sm:$0xff]  ;;  %v1158_v13 = vpack.c.bf16 %v137_v10, %v135_v9  ;;  %v139_v15 = vld [vmem:[#allocation4 + $0x40] sm:$0xff] }
  0x70   :  { %1155 = vmatpush1.bf16.msra.mxu0 %v1154_v7  ;;  %v1160_v14 = vpack.c.bf16 %v142_v12, %v140_v11  ;;  %v141_v16 = vld [vmem:[#allocation4 + $0x50] sm:$0xff]  ;;  %v144_v17 = vld [vmem:[#allocation4 + $0x68] sm:$0xff]  ;;  %v146_v18 = vld [vmem:[#allocation4 + $0x78] sm:$0xff] }
  0x71   :  { %1157 = vmatprep.subr.bf16.mxu0 %v1156_v8  ;;  %v1162_v19 = vpack.c.bf16 %v141_v16, %v139_v15  ;;  %v1164_v20 = vpack.c.bf16 %v146_v18, %v144_v17  ;;  %v143_v21 = vld [vmem:[#allocation4 + $0x60] sm:$0xff]  ;;  %v145_v22 = vld [vmem:[#allocation4 + $0x70] sm:$0xff]  ;;  %v148_v23 = vld [vmem:[#allocation4 + $0x88] sm:$0xff] }
  0x72   :  { %v150_v24 = vld [vmem:[#allocation4 + $0x98] sm:$0xff]  ;;  %v1166_v25 = vpack.c.bf16 %v145_v22, %v143_v21  ;;  %v147_v27 = vld [vmem:[#allocation4 + $0x80] sm:$0xff]  ;;  %v149_v28 = vld [vmem:[#allocation4 + $0x90] sm:$0xff] }
  0x73   :  { %v1168_v26 = vpack.c.bf16 %v150_v24, %v148_v23  ;;  %v152_v29 = vld [vmem:[#allocation4 + $0xa8] sm:$0xff]  ;;  %v154_v30 = vld [vmem:[#allocation4 + $0xb8] sm:$0xff]  ;;  %v1170_v31 = vpack.c.bf16 %v149_v28, %v147_v27  ;;  %v151_v33 = vld [vmem:[#allocation4 + $0xa0] sm:$0xff] }
  0x74   :  { %1159 = vmatpush1.bf16.msra.mxu0 %v1158_v13  ;;  %v1172_v32 = vpack.c.bf16 %v154_v30, %v152_v29  ;;  %v153_v34 = vld [vmem:[#allocation4 + $0xb0] sm:$0xff]  ;;  %v156_v35 = vld [vmem:[#allocation4 + $0xc8] sm:$0xff]  ;;  %v158_v36 = vld [vmem:[#allocation4 + $0xd8] sm:$0xff] }
  0x75   :  { %1161 = vmatprep.subr.bf16.mxu0 %v1160_v14  ;;  %v1174_v37 = vpack.c.bf16 %v153_v34, %v151_v33  ;;  %v1176_v38 = vpack.c.bf16 %v158_v36, %v156_v35  ;;  %v155_v39 = vld [vmem:[#allocation4 + $0xc0] sm:$0xff]  ;;  %v157_v40 = vld [vmem:[#allocation4 + $0xd0] sm:$0xff]  ;;  %v160_v42 = vld [vmem:[#allocation4 + $0xe8] sm:$0xff] }
  0x76   :  { %v113_v41 = vld [vmem:[#allocation2 + $0x8] sm:$0xff]  ;;  %v162_v43 = vld [vmem:[#allocation4 + $0xf8] sm:$0xff]  ;;  %v1178_v44 = vpack.c.bf16 %v157_v40, %v155_v39  ;;  %v159_v46 = vld [vmem:[#allocation4 + $0xe0] sm:$0xff] }
  0x77   :  { %294 = vmatprep.mubr.f32.mxu0 %v113_v41  ;;  %v1180_v45 = vpack.c.bf16 %v162_v43, %v160_v42  ;;  %v161_v47 = vld [vmem:[#allocation4 + $0xf0] sm:$0xff]  ;;  %v164_v48 = vld [vmem:[#allocation4 + $0x108] sm:$0xff]  ;;  %v166_v49 = vld [vmem:[#allocation4 + $0x118] sm:$0xff] }
  0x78   :  { %1163 = vmatpush1.bf16.msra.mxu0 %v1162_v19  ;;  %v1182_v50 = vpack.c.bf16 %v161_v47, %v159_v46  ;;  %v1184_v51 = vpack.c.bf16 %v166_v49, %v164_v48  ;;  %v163_v52 = vld [vmem:[#allocation4 + $0x100] sm:$0xff]  ;;  %v165_v53 = vld [vmem:[#allocation4 + $0x110] sm:$0xff]  ;;  %v168_v54 = vld [vmem:[#allocation4 + $0x128] sm:$0xff]  ;;  %v1526_v48 = vmov 0.0  }
  0x79   :  { %1165 = vmatprep.subr.bf16.mxu0 %v1164_v20  ;;  %v170_v55 = vld [vmem:[#allocation4 + $0x138] sm:$0xff]  ;;  %v1186_v56 = vpack.c.bf16 %v165_v53, %v163_v52  ;;  %v167_v58 = vld [vmem:[#allocation4 + $0x120] sm:$0xff]  ;;  %v169_v59 = vld [vmem:[#allocation4 + $0x130] sm:$0xff]  ;;  %1044 = vmatprep.mubr.msk.f32.mxu1 %vm1528_vm2, %v1526_v48 }
  0x7a   :  { %v1188_v57 = vpack.c.bf16 %v170_v55, %v168_v54  ;;  %v172_v60 = vld [vmem:[#allocation4 + $0x148] sm:$0xff]  ;;  %v174_v61 = vld [vmem:[#allocation4 + $0x158] sm:$0xff]  ;;  %v1190_v62 = vpack.c.bf16 %v169_v59, %v167_v58  ;;  %v171_v0 = vld [vmem:[#allocation4 + $0x140] sm:$0xff] }
  0x7b   :  { %v1192_v63 = vpack.c.bf16 %v174_v61, %v172_v60  ;;  %v173_v1 = vld [vmem:[#allocation4 + $0x150] sm:$0xff]  ;;  %v176_v2 = vld [vmem:[#allocation4 + $0x168] sm:$0xff]  ;;  %v178_v3 = vld [vmem:[#allocation4 + $0x178] sm:$0xff] }
  0x7c   :  { %1167 = vmatpush1.bf16.msra.mxu0 %v1166_v25  ;;  %v1194_v4 = vpack.c.bf16 %v173_v1, %v171_v0  ;;  %v1196_v5 = vpack.c.bf16 %v178_v3, %v176_v2  ;;  %v175_v6 = vld [vmem:[#allocation4 + $0x160] sm:$0xff]  ;;  %v177_v7 = vld [vmem:[#allocation4 + $0x170] sm:$0xff]  ;;  %v180_v8 = vld [vmem:[#allocation4 + $0x188] sm:$0xff]  ;;  %v216_v2 = vlaneseq }
  0x7d   :  { %1169 = vmatprep.subr.bf16.mxu0 %v1168_v26  ;;  %v182_v9 = vld [vmem:[#allocation4 + $0x198] sm:$0xff]  ;;  %v1198_v10 = vpack.c.bf16 %v177_v7, %v175_v6  ;;  %v179_v12 = vld [vmem:[#allocation4 + $0x180] sm:$0xff]  ;;  %v181_v13 = vld [vmem:[#allocation4 + $0x190] sm:$0xff] }
  0x7e   :  { %v1200_v11 = vpack.c.bf16 %v182_v9, %v180_v8  ;;  %v184_v14 = vld [vmem:[#allocation4 + $0x1a8] sm:$0xff]  ;;  %v186_v15 = vld [vmem:[#allocation4 + $0x1b8] sm:$0xff]  ;;  %v1202_v16 = vpack.c.bf16 %v181_v13, %v179_v12  ;;  %v183_v18 = vld [vmem:[#allocation4 + $0x1a0] sm:$0xff]  ;;  %v217_v3 = vshrl.u32 %v216_v2, 7 }
  0x7f   :  { %v1204_v17 = vpack.c.bf16 %v186_v15, %v184_v14  ;;  %v185_v19 = vld [vmem:[#allocation4 + $0x1b0] sm:$0xff]  ;;  %v188_v20 = vld [vmem:[#allocation4 + $0x1c8] sm:$0xff]  ;;  %v190_v21 = vld [vmem:[#allocation4 + $0x1d8] sm:$0xff] }
  0x80   :  { %1171 = vmatpush1.bf16.msra.mxu0 %v1170_v31  ;;  %v1206_v22 = vpack.c.bf16 %v185_v19, %v183_v18  ;;  %v1208_v23 = vpack.c.bf16 %v190_v21, %v188_v20  ;;  %v187_v24 = vld [vmem:[#allocation4 + $0x1c0] sm:$0xff]  ;;  %v189_v25 = vld [vmem:[#allocation4 + $0x1d0] sm:$0xff]  ;;  %v192_v26 = vld [vmem:[#allocation4 + $0x1e8] sm:$0xff]  ;;  %v1669_v6 = vsub.s32 1, %v217_v3  ;;  %v1527_v18 = vmov 0.0|0.0  }
  0x81   :  { %1173 = vmatprep.subr.bf16.mxu0 %v1172_v32  ;;  %v194_v27 = vld [vmem:[#allocation4 + $0x1f8] sm:$0xff]  ;;  %v1210_v28 = vpack.c.bf16 %v189_v25, %v187_v24  ;;  %v191_v30 = vld [vmem:[#allocation4 + $0x1e0] sm:$0xff]  ;;  %v193_v31 = vld [vmem:[#allocation4 + $0x1f0] sm:$0xff]  ;;  %1236 = vmatprep.subr.bf16.mxu1 %v1527_v18 }
  0x82   :  { %v1212_v29 = vpack.c.bf16 %v194_v27, %v192_v26  ;;  %v196_v32 = vld [vmem:[#allocation4 + $0x208] sm:$0xff]  ;;  %v198_v33 = vld [vmem:[#allocation4 + $0x218] sm:$0xff]  ;;  %v1214_v34 = vpack.c.bf16 %v193_v31, %v191_v30  ;;  %v195_v36 = vld [vmem:[#allocation4 + $0x200] sm:$0xff] }
  0x83   :  { %v1216_v35 = vpack.c.bf16 %v198_v33, %v196_v32  ;;  %v202_v39 = vld [vmem:[#allocation4 + $0x238] sm:$0xff]  ;;  %v112_v40 = vld [vmem:[#allocation2] sm:$0xff]  ;;  %v199_v43 = vld [vmem:[#allocation4 + $0x220] sm:$0xff] }
  0x84   :  { %1175 = vmatpush1.bf16.msra.mxu0 %v1174_v37  ;;  %v197_v37 = vld [vmem:[#allocation4 + $0x210] sm:$0xff]  ;;  %v206_v46 = vld [vmem:[#allocation4 + $0x258] sm:$0xff]  ;;  %v208_v52 = vld [vmem:[#allocation4 + $0x268] sm:$0xff] }
  0x85   :  { %1177 = vmatprep.subr.bf16.mxu0 %v1176_v38  ;;  %v200_v38 = vld [vmem:[#allocation4 + $0x228] sm:$0xff]  ;;  %v1218_v41 = vpack.c.bf16 %v197_v37, %v195_v36  ;;  %v210_v53 = vld [vmem:[#allocation4 + $0x278] sm:$0xff]  ;;  %v458_v26 = vld [vmem:[#allocation7] sm:$0xff] }
  0x86   :  { %v1220_v42 = vpack.c.bf16 %v202_v39, %v200_v38  ;;  %v1228_v55 = vpack.c.bf16 %v210_v53, %v208_v52  ;;  %v212_v58 = vld [vmem:[#allocation4 + $0x288] sm:$0xff]  ;;  %v214_v59 = vld [vmem:[#allocation4 + $0x298] sm:$0xff]  ;;  %v460_v31 = vld [vmem:[#allocation7 + $0x10] sm:$0x3] }
  0x87   :  { %v1232_v61 = vpack.c.bf16 %v214_v59, %v212_v58  ;;  %v114_v1 = vld [vmem:[#allocation2 + $0x10] sm:$0xff]  ;;  %v459_v27 = vld [vmem:[#allocation7 + $0x8] sm:$0xff]  ;;  %v426_v33 = vld [vmem:[#allocation6] sm:$0xff] }
  0x88   :  { %1179 = vmatpush1.bf16.msra.mxu0 %v1178_v44  ;;  %v201_v44 = vld [vmem:[#allocation4 + $0x230] sm:$0xff]  ;;  %v443_v30 = vld [vmem:[#allocation6 + $0x88] sm:$0xff]  ;;  %v445_v38 = vld [vmem:[#allocation6 + $0x98] sm:$0xff] }
  0x89   :  { %1181 = vmatprep.subr.bf16.mxu0 %v1180_v45  ;;  %v204_v45 = vld [vmem:[#allocation4 + $0x248] sm:$0xff]  ;;  %v1222_v47 = vpack.c.bf16 %v201_v44, %v199_v43  ;;  %v444_v37 = vld [vmem:[#allocation6 + $0x90] sm:$0xff]  ;;  %v446_v43 = vld [vmem:[#allocation6 + $0xa0] sm:$0xff] }
  0x8a   :  { %v1224_v49 = vpack.c.bf16 %v206_v46, %v204_v45  ;;  %v1243_v39 = vpack.c.bf16 %v445_v38, %v444_v37  ;;  %v447_v44 = vld [vmem:[#allocation6 + $0xa8] sm:$0xff]  ;;  %v430_v46 = vld [vmem:[#allocation6 + $0x20] sm:$0xff]  ;;  %v432_v53 = vld [vmem:[#allocation6 + $0x30] sm:$0xff] }
  0x8b   :  { %v1247_v45 = vpack.c.bf16 %v447_v44, %v446_v43  ;;  %v434_v58 = vld [vmem:[#allocation6 + $0x40] sm:$0xff]  ;;  %v435_v59 = vld [vmem:[#allocation6 + $0x48] sm:$0xff]  ;;  %v437_v2 = vld [vmem:[#allocation6 + $0x58] sm:$0xff] }
  0x8c   :  { %1183 = vmatpush1.bf16.msra.mxu0 %v1182_v50  ;;  %v203_v50 = vld [vmem:[#allocation4 + $0x240] sm:$0xff] }
  0x8d   :  { %1185 = vmatprep.subr.bf16.mxu0 %v1184_v51  ;;  %v205_v51 = vld [vmem:[#allocation4 + $0x250] sm:$0xff] }
  0x8e   :  { %v1226_v54 = vpack.c.bf16 %v205_v51, %v203_v50  ;;  %v448_v50 = vld [vmem:[#allocation6 + $0xb0] sm:$0xff]  ;;  %v449_v51 = vld [vmem:[#allocation6 + $0xb8] sm:$0xff] }
  0x8f   :  { %v1251_v52 = vpack.c.bf16 %v449_v51, %v448_v50 }
  0x90   :  { %1187 = vmatpush1.bf16.msra.mxu0 %v1186_v56  ;;  %v207_v56 = vld [vmem:[#allocation4 + $0x260] sm:$0xff] }
  0x91   :  { %1189 = vmatprep.subr.bf16.mxu0 %v1188_v57  ;;  %v209_v57 = vld [vmem:[#allocation4 + $0x270] sm:$0xff] }
  0x92   :  { %v1230_v60 = vpack.c.bf16 %v209_v57, %v207_v56  ;;  %v451_v57 = vld [vmem:[#allocation6 + $0xc8] sm:$0xff] }
  0x94   :  { %1191 = vmatpush1.bf16.msra.mxu0 %v1190_v62  ;;  %v211_v62 = vld [vmem:[#allocation4 + $0x280] sm:$0xff] }
  0x95   :  { %1193 = vmatprep.subr.bf16.mxu0 %v1192_v63  ;;  %v213_v63 = vld [vmem:[#allocation4 + $0x290] sm:$0xff] }
  0x96   :  { %v1234_v0 = vpack.c.bf16 %v213_v63, %v211_v62  ;;  %v453_v62 = vld [vmem:[#allocation6 + $0xd8] sm:$0xff]  ;;  %v1257_v63 = vpack.c.bf16 %v435_v59, %v434_v58  ;;  %v637_v59 = vld [vmem:[%s1828_s5 + $0x20] sm:$0xff] }
  0x98   :  { %1195 = vmatpush1.bf16.msra.mxu0 %v1194_v4  ;;  %v1667_v4 = vsub.s32 0, %v217_v3  ;;  %v454_v3 = vld [vmem:[#allocation6 + $0xe0] sm:$0xff] }
  0x99   :  { %1197 = vmatprep.subr.bf16.mxu0 %v1196_v5  ;;  %v116_v5 = vld [vmem:[#allocation10] ss:$8 sm:$0x3] }
  0x9a   :  { %v219_v7 = vrot.slane %v116_v5, %v1667_v4  ;;  %v223_v8 = vrot.slane %v116_v5, %v1669_v6  ;;  %v455_v5 = vld [vmem:[#allocation6 + $0xe8] sm:$0xff] }
  0x9c   :  { %1199 = vmatpush1.bf16.msra.mxu0 %v1198_v10 }
  0x9d   :  { %1201 = vmatprep.subr.bf16.mxu0 %v1200_v11 }
  0xa0   :  { %1203 = vmatpush1.bf16.msra.mxu0 %v1202_v16 }
  0xa1   :  { %1205 = vmatprep.subr.bf16.mxu0 %v1204_v17 }
  0xa4   :  { %1207 = vmatpush1.bf16.msra.mxu0 %v1206_v22 }
  0xa5   :  { %1209 = vmatprep.subr.bf16.mxu0 %v1208_v23 }
  0xa8   :  { %1211 = vmatpush1.bf16.msra.mxu0 %v1210_v28  ;;  %v1237_v28 = vpack.c.bf16 %v459_v27, %v458_v26 }
  0xa9   :  { %1213 = vmatprep.subr.bf16.mxu0 %v1212_v29  ;;  %v442_v29 = vld [vmem:[#allocation6 + $0x80] sm:$0xff] }
  0xaa   :  { %1238 = vmatpush3.bf16.msra.mxu1 %v1237_v28  ;;  %v1239_v32 = vpack.c.bf16 %v443_v30, %v442_v29  ;;  %v118_v29 = vld [vmem:[#allocation10 + $0x1] ss:$8 sm:$0x3]  ;;  %v120_v30 = vld [vmem:[#allocation10 + $0x2] ss:$8 sm:$0x3] }
  0xab   :  { %1042 = vmatprep.subr.mxu1 %v1526_v48 }
  0xac   :  { %1215 = vmatpush1.bf16.msra.mxu0 %v1214_v34  ;;  %v427_v34 = vld [vmem:[#allocation6 + $0x8] sm:$0xff] }
  0xad   :  { %1217 = vmatprep.subr.bf16.mxu0 %v1216_v35  ;;  %v115_v35 = vld [vmem:[%s1824_s1] sm:$0xff]  ;;  %v1241_v36 = vpack.c.bf16 %v427_v34, %v426_v33 }
  0xae   :  { %1043 = vmatpush3.msk.msra.mxu1 %vm465_vm1, %v460_v31  ;;  %v404_v31 = vrot.slane %v118_v29, %v1667_v4 }
  0xaf   :  { %295 = vmatmul.mubr.f32.vlgmr.msra.gmra.mrb[0].mxu0 %v112_v40  ;;  %1045 = vmatmul.mubr.msk.f32.vlgmr.msra.gmra.mrb[0].mxu1 %vm461_vm3, %v115_v35  ;;  %v428_v40 = vld [vmem:[#allocation6 + $0x10] sm:$0xff]  ;;  %v417_v35 = vrot.slane %v120_v30, %v1667_v4 }
  0xb0   :  { %1219 = vmatpush1.bf16.msra.mxu0 %v1218_v41  ;;  %365 = vmatprep.mubr.f32.mxu0 %v1526_v48  ;;  %v429_v41 = vld [vmem:[#allocation6 + $0x18] sm:$0xff] }
  0xb1   :  { %1221 = vmatprep.subr.bf16.mxu0 %v1220_v42  ;;  %1240 = vmatprep.subr.bf16.mxu1 %v1239_v32  ;;  %v1245_v42 = vpack.c.bf16 %v429_v41, %v428_v40  ;;  %v408_v32 = vrot.slane %v118_v29, %v1669_v6  ;;  %v123_v29 = vld [vmem:[#allocation10 + $0x5] ss:$0 sm:$0xff] }
  0xb2   :  { %1242 = vmatpush3.bf16.msra.mxu1 %v1241_v36  ;;  %v421_v36 = vrot.slane %v120_v30, %v1669_v6 }
  0xb3   :  { %1244 = vmatprep.subr.bf16.mxu1 %v1243_v39 }
  0xb4   :  { %1223 = vmatpush1.bf16.msra.mxu0 %v1222_v47  ;;  %v431_v47 = vld [vmem:[#allocation6 + $0x28] sm:$0xff] }
  0xb5   :  { %1225 = vmatprep.subr.bf16.mxu0 %v1224_v49  ;;  %v1249_v49 = vpack.c.bf16 %v431_v47, %v430_v46  ;;  %v121_v46 = vld [vmem:[#allocation10 + $0x3] ss:$0 sm:$0xff] }
  0xb6   :  { %1246 = vmatpush3.bf16.msra.mxu1 %v1245_v42 }
  0xb7   :  { %1248 = vmatprep.subr.bf16.mxu1 %v1247_v45 }
  0xb8   :  { %1227 = vmatpush1.bf16.msra.mxu0 %v1226_v54  ;;  %v433_v54 = vld [vmem:[#allocation6 + $0x38] sm:$0xff] }
  0xb9   :  { %1229 = vmatprep.subr.bf16.mxu0 %v1228_v55  ;;  %v450_v55 = vld [vmem:[#allocation6 + $0xc0] sm:$0xff]  ;;  %v1253_v56 = vpack.c.bf16 %v433_v54, %v432_v53  ;;  %v633_v53 = vld [vmem:[%s1828_s5] sm:$0xff]  ;;  %v634_v54 = vld [vmem:[%s1828_s5 + $0x8] sm:$0xff] }
  0xba   :  { %1250 = vmatpush3.bf16.msra.mxu1 %v1249_v49 }
  0xbb   :  { %1252 = vmatprep.subr.bf16.mxu1 %v1251_v52 }
  0xbc   :  { %1231 = vmatpush1.bf16.msra.mxu0 %v1230_v60  ;;  %v1255_v60 = vpack.c.bf16 %v451_v57, %v450_v55  ;;  %v1272_v55 = vpack.c.bf16 %v634_v54, %v633_v53  ;;  %v636_v57 = vld [vmem:[%s1828_s5 + $0x18] sm:$0xff]  ;;  %v751_v53 = vld [vmem:[#allocation9 + $0x50] sm:$0xff]  ;;  %v752_v54 = vld [vmem:[#allocation9 + $0x58] sm:$0xff] }
  0xbd   :  { %1233 = vmatprep.subr.bf16.mxu0 %v1232_v61  ;;  %v452_v61 = vld [vmem:[#allocation6 + $0xd0] sm:$0xff] }
  0xbe   :  { %1254 = vmatpush3.bf16.msra.mxu1 %v1253_v56  ;;  %v635_v56 = vld [vmem:[%s1828_s5 + $0x10] sm:$0xff] }
  0xbf   :  { %1256 = vmatprep.subr.bf16.mxu1 %v1255_v60  ;;  %v1275_v58 = vpack.c.bf16 %v636_v57, %v635_v56  ;;  %v638_v60 = vld [vmem:[%s1828_s5 + $0x28] sm:$0xff]  ;;  %v753_v56 = vld [vmem:[#allocation9 + $0x60] sm:$0xff]  ;;  %v754_v57 = vld [vmem:[#allocation9 + $0x68] sm:$0xff] }
  0xc0   :  { %1235 = vmatpush1.bf16.msra.mxu0 %v1234_v0  ;;  %v1259_v0 = vpack.c.bf16 %v453_v62, %v452_v61  ;;  %v1278_v61 = vpack.c.bf16 %v638_v60, %v637_v59  ;;  %v639_v62 = vld [vmem:[%s1828_s5 + $0x30] sm:$0xff]  ;;  %v755_v59 = vld [vmem:[#allocation9 + $0x70] sm:$0xff]  ;;  %v756_v60 = vld [vmem:[#allocation9 + $0x78] sm:$0xff] }
  0xc1   :  { %1319 = vmatprep.subr.bf16.mxu0 %v1527_v18 }
  0xc2   :  { %1258 = vmatpush3.bf16.msra.mxu1 %v1257_v63  ;;  %v640_v63 = vld [vmem:[%s1828_s5 + $0x38] sm:$0xff] }
  0xc3   :  { %945 = vmatmul.mubr.msk.f32.vlgmr.msra.gmra.mrb[0].mxu0 %vm226_vm0, %v114_v1  ;;  %v436_v1 = vld [vmem:[#allocation6 + $0x50] sm:$0xff]  ;;  %1260 = vmatprep.subr.bf16.mxu1 %v1259_v0  ;;  %v1281_v0 = vpack.c.bf16 %v640_v63, %v639_v62 }
  0xc4   :  { %1149 = vmatprep.mubr.msk.f32.mxu0 %vm1528_vm2, %v1526_v48 }
 0x182   :  { %v535_v42 = vpop.f32.mrb[0].mxu1 }
 0x183   :  { %v1046_v43 = vpop.f32.mrb[1].mxu1 }
 0x184   :  { %v742_v43 = vld [vmem:[#allocation9 + $0x8] sm:$0xff] }
 0x196   :  { %v367_v9 = vpop.f32.mrb[0].mxu0 }
 0x197   :  { %v1343_v10 = vadd.f32 %v367_v9, %v219_v7  ;;  %v369_v11 = vpop.f32.mrb[1].mxu0  ;;  %v1261_v7 = vpack.c.bf16 %v437_v2, %v436_v1  ;;  %v438_v9 = vld [vmem:[#allocation6 + $0x60] sm:$0xff]  ;;  %v641_v1 = vld [vmem:[%s1828_s5 + $0x40] sm:$0xff]  ;;  %v642_v2 = vld [vmem:[%s1828_s5 + $0x48] sm:$0xff] }
 0x198   :  { %v1344_v12 = vadd.f32 %v369_v11, %v223_v8  ;;  %v1263_v8 = vpack.c.bf16 %v455_v5, %v454_v3  ;;  %v456_v11 = vld [vmem:[#allocation6 + $0xf0] sm:$0xff]  ;;  %v1284_v3 = vpack.c.bf16 %v642_v2, %v641_v1  ;;  %v643_v5 = vld [vmem:[%s1828_s5 + $0x50] sm:$0xff] }
 0x199   :  { %v372_v13 = vmul.f32 0.2, %v1343_v10  ;;  %1262 = vmatpush3.bf16.msra.mxu1 %v1261_v7  ;;  %v644_v7 = vld [vmem:[%s1828_s5 + $0x58] sm:$0xff] }
 0x19a   :  { %v373_v14 = vmul.f32 0.2, %v1344_v12  ;;  %1264 = vmatprep.subr.bf16.mxu1 %v1263_v8  ;;  %v1287_v8 = vpack.c.bf16 %v644_v7, %v643_v5 }
 0x19b   :  { %v374_v15 = vmax.f32 %v1343_v10, %v372_v13  ;;  %v439_v10 = vld [vmem:[#allocation6 + $0x68] sm:$0xff] }
 0x19c   :  { %v375_v16 = vmax.f32 %v1344_v12, %v373_v14  ;;  %v457_v12 = vld [vmem:[#allocation6 + $0xf8] sm:$0xff]  ;;  %v1265_v13 = vpack.c.bf16 %v439_v10, %v438_v9  ;;  %v645_v9 = vld [vmem:[%s1828_s5 + $0x60] sm:$0xff]  ;;  %v646_v10 = vld [vmem:[%s1828_s5 + $0x68] sm:$0xff] }
 0x19d   :  { %v1267_v14 = vpack.c.bf16 %v457_v12, %v456_v11  ;;  %v1290_v11 = vpack.c.bf16 %v646_v10, %v645_v9  ;;  %v647_v12 = vld [vmem:[%s1828_s5 + $0x70] sm:$0xff] }
 0x19e   :  { %v376_v17 = vadd.f32 %v375_v16, %v374_v15  ;;  %1266 = vmatpush3.bf16.msra.mxu1 %v1265_v13  ;;  %v648_v13 = vld [vmem:[%s1828_s5 + $0x78] sm:$0xff]  ;;  %v125_v9 = vld [vmem:[#allocation10 + $0x7] ss:$0 sm:$0xff] }
 0x19f   :  { %1268 = vmatprep.subr.bf16.mxu1 %v1267_v14  ;;  %v1293_v14 = vpack.c.bf16 %v648_v13, %v647_v12 }
 0x1a0   :  { %377 = vadd.xlane.f32.xlu0 %v376_v17 }
 0x22d   :  { %v378_v19 = vpop.xlane.xlu0 %377 }
 0x22e   :  { %v380_v20 = vmul.f32 0.00390625, %v378_v19 }
 0x230   :  { %v1675_v21 = vsub.f32 %v374_v15, %v380_v20  ;;  %v1677_v22 = vsub.f32 %v375_v16, %v380_v20  ;;  %v440_v15 = vld [vmem:[#allocation6 + $0x70] sm:$0xff]  ;;  %v441_v16 = vld [vmem:[#allocation6 + $0x78] sm:$0xff] }
 0x231   :  { %v1269_v17 = vpack.c.bf16 %v441_v16, %v440_v15 }
 0x232   :  { %v383_v23 = vmul.f32 %v1675_v21, %v1675_v21  ;;  %v384_v24 = vmul.f32 %v1677_v22, %v1677_v22 }
 0x233   :  { %1270 = vmatpush3.bf16.msra.mxu1 %v1269_v17 }
 0x234   :  { %v385_v25 = vadd.f32 %v384_v24, %v383_v23  ;;  %1271 = vmatprep.subr.bf16.mxu1 %v1527_v18 }
 0x236   :  { %386 = vadd.xlane.f32.xlu0 %v385_v25 }
 0x2c3   :  { %v387_v19 = vpop.xlane.xlu0 %386 }
 0x2c4   :  { %v388_v20 = vmul.f32 0.003921569, %v387_v19 }
 0x2c6   :  { %1360 = vrsqrt.f32 %v388_v20  ;;  %vm391_vm4 = vcmp.eq.f32.partialorder %v388_v20, inf  ;;  %v394_v25 = vand.u32 2147483648, %v388_v20  ;;  %vm393_vm5 = vcmp.eq.f32.partialorder %v388_v20, 0.0 }
 0x2d0   :  { %v1361_v23 = vpop.eup %1360 }
 0x2d1   :  { %v390_v24 = vmul.f32 %v1361_v23, %v388_v20 }
 0x2d3   :  { %v392_v26 = vsel %vm391_vm4, %v388_v20, %v390_v24 }
 0x2d4   :  { %v395_v27 = vsel %vm393_vm5, %v394_v25, %v392_v26 }
 0x2d5   :  { %v396_v28 = vadd.f32 1e-06, %v395_v27  ;;  %v122_v27 = vld [vmem:[#allocation10 + $0x4] ss:$0 sm:$0xff] }
 0x2d7   :  { %1362 = vrcp.f32 %v396_v28 }
 0x2e1   :  { %v1363_v33 = vpop.eup %1362 }
 0x2e2   :  { %v399_v34 = vmul.f32 %v1363_v33, %v1677_v22  ;;  %v398_v37 = vmul.f32 %v1363_v33, %v1675_v21 }
 0x2e4   :  { %v412_v38 = vmul.f32 %v408_v32, %v399_v34  ;;  %v411_v39 = vmul.f32 %v404_v31, %v398_v37  ;;  %v124_v32 = vld [vmem:[#allocation10 + $0x6] ss:$0 sm:$0xff] }
 0x2e6   :  { %v425_v40 = vadd.f32 %v421_v36, %v412_v38  ;;  %v424_v41 = vadd.f32 %v417_v35, %v411_v39 }
 0x2e8   :  { %603 = vmatprep.mubr.f32.mxu1 %v425_v40 }
 0x2e9   :  { %604 = vmatmul.mubr.f32.vlgmr.msra.gmra.mrb[2].mxu1 %v424_v41 }
 0x2ea   :  { %1079 = vmatprep.mubr.msk.f32.mxu1 %vm1528_vm2, %v1526_v48  ;;  %1273 = vmatpush3.bf16.msra.mxu1 %v1272_v55  ;;  %v1311_v55 = vpack.c.bf16 %v752_v54, %v751_v53 }
 0x2eb   :  { %1274 = vmatprep.subr.bf16.mxu1 %v1527_v18 }
 0x2ee   :  { %1276 = vmatpush3.bf16.msra.mxu1 %v1275_v58  ;;  %v1314_v58 = vpack.c.bf16 %v754_v57, %v753_v56  ;;  %v128_v56 = vld [vmem:[#allocation10 + $0x12] ss:$0 sm:$0xff] }
 0x2ef   :  { %1277 = vmatprep.subr.bf16.mxu1 %v1527_v18 }
 0x2f2   :  { %1279 = vmatpush3.bf16.msra.mxu1 %v1278_v61  ;;  %v1317_v61 = vpack.c.bf16 %v756_v60, %v755_v59 }
 0x2f3   :  { %1280 = vmatprep.subr.bf16.mxu1 %v1527_v18 }
 0x2f6   :  { %1282 = vmatpush3.bf16.msra.mxu1 %v1281_v0 }
 0x2f7   :  { %1283 = vmatprep.subr.bf16.mxu1 %v1527_v18 }
 0x2fa   :  { %1285 = vmatpush3.bf16.msra.mxu1 %v1284_v3 }
 0x2fb   :  { %1286 = vmatprep.subr.bf16.mxu1 %v1527_v18 }
 0x2fe   :  { %1288 = vmatpush3.bf16.msra.mxu1 %v1287_v8 }
 0x2ff   :  { %1289 = vmatprep.subr.bf16.mxu1 %v1527_v18 }
 0x302   :  { %1291 = vmatpush3.bf16.msra.mxu1 %v1290_v11  ;;  %v126_v11 = vld [vmem:[#allocation10 + $0x10] ss:$0 sm:$0xff] }
 0x303   :  { %1292 = vmatprep.subr.bf16.mxu1 %v1527_v18 }
 0x306   :  { %1294 = vmatpush3.bf16.msra.mxu1 %v1293_v14  ;;  %v127_v14 = vld [vmem:[#allocation10 + $0x11] ss:$0 sm:$0xff] }
 0x307   :  { %1295 = vmatprep.subr.bf16.mxu1 %v1527_v18 }
 0x3bc   :  { %v984_v44 = vpop.f32.mrb[2].mxu1 }
 0x3bd   :  { %v985_v45 = vpop.f32.mrb[3].mxu1 }
 0x3be   :  { %v986_v22 = vadd.f32 %v985_v45, %v984_v44  ;;  %v743_v45 = vld [vmem:[#allocation9 + $0x10] sm:$0xff] }
 0x3c0   :  { %v606_v4 = vadd.f32 %v986_v22, %v535_v42  ;;  %v741_v42 = vld [vmem:[#allocation9] sm:$0xff] }
 0x3c1   :  { %v1296_v44 = vpack.c.bf16 %v742_v43, %v741_v42  ;;  %v859_v42 = vld [vmem:[%s1830_s7 + $0x50] sm:$0xff]  ;;  %v860_v43 = vld [vmem:[%s1830_s7 + $0x58] sm:$0xff] }
 0x3c2   :  { %v609_v47 = vadd.f32 %v606_v4, %v121_v46  ;;  %v745_v46 = vld [vmem:[#allocation9 + $0x20] sm:$0xff]  ;;  %v746_v4 = vld [vmem:[#allocation9 + $0x28] sm:$0xff] }
 0x3c4   :  { %v610_v6 = vmul.f32 0.2, %v609_v47 }
 0x3c6   :  { %v611_v49 = vmax.f32 %v609_v47, %v610_v6  ;;  %v1302_v47 = vpack.c.bf16 %v746_v4, %v745_v46  ;;  %v747_v6 = vld [vmem:[#allocation9 + $0x30] sm:$0xff]  ;;  %v863_v46 = vld [vmem:[%s1830_s7 + $0x70] sm:$0xff]  ;;  %v864_v4 = vld [vmem:[%s1830_s7 + $0x78] sm:$0xff] }
 0x3c8   :  { %612 = vadd.xlane.f32.xlu1 %v611_v49 }
 0x455   :  { %v613_v21 = vpop.xlane.xlu1 %612 }
 0x456   :  { %v615_v50 = vmul.f32 0.0078125, %v613_v21 }
 0x458   :  { %v616_v51 = vsub.f32 %v611_v49, %v615_v50  ;;  %v748_v49 = vld [vmem:[#allocation9 + $0x38] sm:$0xff]  ;;  %v749_v50 = vld [vmem:[#allocation9 + $0x40] sm:$0xff] }
 0x459   :  { %v1305_v21 = vpack.c.bf16 %v748_v49, %v747_v6 }
 0x45a   :  { %v617_v52 = vmul.f32 %v616_v51, %v616_v51 }
 0x45c   :  { %618 = vadd.xlane.f32.xlu1 %v617_v52 }
 0x4e9   :  { %v619_v15 = vpop.xlane.xlu1 %618 }
 0x4ea   :  { %v620_v16 = vmul.f32 0.007874016, %v619_v15 }
 0x4ec   :  { %1364 = vrsqrt.f32 %v620_v16  ;;  %vm623_vm6 = vcmp.eq.f32.partialorder %v620_v16, inf  ;;  %v626_v20 = vand.u32 2147483648, %v620_v16  ;;  %vm625_vm7 = vcmp.eq.f32.partialorder %v620_v16, 0.0 }
 0x4f6   :  { %v1365_v17 = vpop.eup %1364 }
 0x4f7   :  { %v622_v19 = vmul.f32 %v1365_v17, %v620_v16 }
 0x4f9   :  { %v624_v23 = vsel %vm623_vm6, %v620_v16, %v622_v19 }
 0x4fa   :  { %v627_v24 = vsel %vm625_vm7, %v626_v20, %v624_v23 }
 0x4fb   :  { %v628_v25 = vadd.f32 1e-06, %v627_v24 }
 0x4fd   :  { %1366 = vrcp.f32 %v628_v25 }
 0x507   :  { %v1367_v26 = vpop.eup %1366 }
 0x508   :  { %v630_v28 = vmul.f32 %v1367_v26, %v616_v51  ;;  %v750_v51 = vld [vmem:[#allocation9 + $0x48] sm:$0xff] }
 0x509   :  { %v1308_v52 = vpack.c.bf16 %v750_v51, %v749_v50 }
 0x50a   :  { %v631_v30 = vmul.f32 %v630_v28, %v122_v27  ;;  %v849_v27 = vld [vmem:[%s1830_s7] sm:$0xff]  ;;  %v850_v28 = vld [vmem:[%s1830_s7 + $0x8] sm:$0xff] }
 0x50c   :  { %v632_v31 = vadd.f32 %v631_v30, %v123_v29  ;;  %v1320_v29 = vpack.c.bf16 %v850_v28, %v849_v27  ;;  %v851_v30 = vld [vmem:[%s1830_s7 + $0x10] sm:$0xff] }
 0x50e   :  { %1080 = vmatmul.mubr.f32.vlgmr.msra.gmra.mrb[4].mxu1 %v632_v31  ;;  %1321 = vmatpush3.bf16.msra.mxu0 %v1320_v29  ;;  %v852_v31 = vld [vmem:[%s1830_s7 + $0x18] sm:$0xff] }
 0x50f   :  { %1114 = vmatprep.mubr.msk.f32.mxu1 %vm1528_vm2, %v1526_v48  ;;  %1297 = vmatpush3.bf16.msra.mxu1 %v1296_v44  ;;  %v744_v48 = vld [vmem:[#allocation9 + $0x18] sm:$0xff]  ;;  %v1335_v44 = vpack.c.bf16 %v860_v43, %v859_v42 }
 0x510   :  { %1298 = vmatprep.subr.bf16.mxu1 %v1527_v18  ;;  %v1299_v22 = vpack.c.bf16 %v744_v48, %v743_v45  ;;  %1322 = vmatprep.subr.bf16.mxu0 %v1527_v18  ;;  %v861_v45 = vld [vmem:[%s1830_s7 + $0x60] sm:$0xff]  ;;  %v862_v48 = vld [vmem:[%s1830_s7 + $0x68] sm:$0xff] }
 0x513   :  { %1300 = vmatpush3.bf16.msra.mxu1 %v1299_v22  ;;  %v1338_v22 = vpack.c.bf16 %v862_v48, %v861_v45 }
 0x514   :  { %1301 = vmatprep.subr.bf16.mxu1 %v1527_v18 }
 0x517   :  { %1303 = vmatpush3.bf16.msra.mxu1 %v1302_v47  ;;  %v1341_v47 = vpack.c.bf16 %v864_v4, %v863_v46 }
 0x518   :  { %1304 = vmatprep.subr.bf16.mxu1 %v1527_v18 }
 0x51b   :  { %1306 = vmatpush3.bf16.msra.mxu1 %v1305_v21 }
 0x51c   :  { %1307 = vmatprep.subr.bf16.mxu1 %v1527_v18 }
 0x51f   :  { %1309 = vmatpush3.bf16.msra.mxu1 %v1308_v52 }
 0x520   :  { %1310 = vmatprep.subr.bf16.mxu1 %v1527_v18 }
 0x523   :  { %1312 = vmatpush3.bf16.msra.mxu1 %v1311_v55 }
 0x524   :  { %1313 = vmatprep.subr.bf16.mxu1 %v1527_v18 }
 0x527   :  { %1315 = vmatpush3.bf16.msra.mxu1 %v1314_v58  ;;  %v129_v58 = vld [vmem:[#allocation10 + $0x13] ss:$0 sm:$0xff] }
 0x528   :  { %1316 = vmatprep.subr.bf16.mxu1 %v1527_v18 }
 0x52b   :  { %1318 = vmatpush3.bf16.msra.mxu1 %v1317_v61 }
 0x5e1   :  { %v715_v33 = vpop.f32.mrb[4].mxu1 }
 0x5e2   :  { %v716_v34 = vadd.f32 %v715_v33, %v124_v32  ;;  %v1081_v35 = vpop.f32.mrb[5].mxu1  ;;  %v1323_v32 = vpack.c.bf16 %v852_v31, %v851_v30  ;;  %v853_v33 = vld [vmem:[%s1830_s7 + $0x20] sm:$0xff] }
 0x5e4   :  { %v719_v36 = vmul.f32 0.2, %v716_v34  ;;  %1324 = vmatpush3.bf16.msra.mxu0 %v1323_v32 }
 0x5e5   :  { %1325 = vmatprep.subr.bf16.mxu0 %v1527_v18 }
 0x5e6   :  { %v720_v37 = vmax.f32 %v716_v34, %v719_v36  ;;  %v854_v34 = vld [vmem:[%s1830_s7 + $0x28] sm:$0xff]  ;;  %v855_v36 = vld [vmem:[%s1830_s7 + $0x30] sm:$0xff] }
 0x5e7   :  { %v1326_v35 = vpack.c.bf16 %v854_v34, %v853_v33 }
 0x5e8   :  { %721 = vadd.xlane.f32.xlu0 %v720_v37 }
 0x5e9   :  { %1327 = vmatpush3.bf16.msra.mxu0 %v1326_v35 }
 0x5ea   :  { %1328 = vmatprep.subr.bf16.mxu0 %v1527_v18 }
 0x675   :  { %v722_v38 = vpop.xlane.xlu0 %721 }
 0x676   :  { %v723_v39 = vmul.f32 0.0078125, %v722_v38 }
 0x678   :  { %v724_v40 = vsub.f32 %v720_v37, %v723_v39  ;;  %v856_v37 = vld [vmem:[%s1830_s7 + $0x38] sm:$0xff]  ;;  %v857_v39 = vld [vmem:[%s1830_s7 + $0x40] sm:$0xff] }
 0x679   :  { %v1329_v38 = vpack.c.bf16 %v856_v37, %v855_v36 }
 0x67a   :  { %v725_v41 = vmul.f32 %v724_v40, %v724_v40 }
 0x67b   :  { %1330 = vmatpush3.bf16.msra.mxu0 %v1329_v38 }
 0x67c   :  { %726 = vadd.xlane.f32.xlu1 %v725_v41  ;;  %1331 = vmatprep.subr.bf16.mxu0 %v1527_v18 }
 0x709   :  { %v727_v62 = vpop.xlane.xlu1 %726 }
 0x70a   :  { %v728_v63 = vmul.f32 0.007874016, %v727_v62 }
 0x70c   :  { %1368 = vrsqrt.f32 %v728_v63  ;;  %vm731_vm8 = vcmp.eq.f32.partialorder %v728_v63, inf  ;;  %v734_v2 = vand.u32 2147483648, %v728_v63  ;;  %vm733_vm9 = vcmp.eq.f32.partialorder %v728_v63, 0.0 }
 0x716   :  { %v1369_v0 = vpop.eup %1368 }
 0x717   :  { %v730_v1 = vmul.f32 %v1369_v0, %v728_v63 }
 0x719   :  { %v732_v3 = vsel %vm731_vm8, %v728_v63, %v730_v1 }
 0x71a   :  { %v735_v5 = vsel %vm733_vm9, %v734_v2, %v732_v3 }
 0x71b   :  { %v736_v7 = vadd.f32 1e-06, %v735_v5 }
 0x71d   :  { %1370 = vrcp.f32 %v736_v7 }
 0x727   :  { %v1371_v8 = vpop.eup %1370 }
 0x728   :  { %v738_v10 = vmul.f32 %v1371_v8, %v724_v40  ;;  %v858_v40 = vld [vmem:[%s1830_s7 + $0x48] sm:$0xff] }
 0x729   :  { %v1332_v41 = vpack.c.bf16 %v858_v40, %v857_v39 }
 0x72a   :  { %v739_v12 = vmul.f32 %v738_v10, %v125_v9 }
 0x72b   :  { %1333 = vmatpush3.bf16.msra.mxu0 %v1332_v41 }
 0x72c   :  { %v740_v13 = vadd.f32 %v739_v12, %v126_v11  ;;  %1334 = vmatprep.subr.bf16.mxu0 %v1527_v18 }
 0x72e   :  { %1115 = vmatmul.mubr.f32.vlgmr.msra.gmra.mrb[6].mxu1 %v740_v13 }
 0x72f   :  { %1336 = vmatpush3.bf16.msra.mxu0 %v1335_v44 }
 0x730   :  { %1337 = vmatprep.subr.bf16.mxu0 %v1527_v18 }
 0x733   :  { %1339 = vmatpush3.bf16.msra.mxu0 %v1338_v22 }
 0x734   :  { %1340 = vmatprep.subr.bf16.mxu0 %v1527_v18  ;;  %v130_v18 = vld [vmem:[#allocation10 + $0x14] ss:$0 sm:$0xff] }
 0x737   :  { %1342 = vmatpush3.bf16.msra.mxu0 %v1341_v47 }
 0x801   :  { %v823_v15 = vpop.f32.mrb[6].mxu1 }
 0x802   :  { %v824_v16 = vadd.f32 %v823_v15, %v127_v14  ;;  %v1116_v17 = vpop.f32.mrb[7].mxu1 }
 0x804   :  { %v827_v19 = vmul.f32 0.2, %v824_v16 }
 0x806   :  { %v828_v20 = vmax.f32 %v824_v16, %v827_v19 }
 0x808   :  { %829 = vadd.xlane.f32.xlu0 %v828_v20 }
 0x895   :  { %v830_v23 = vpop.xlane.xlu0 %829 }
 0x896   :  { %v831_v24 = vmul.f32 0.0078125, %v830_v23 }
 0x898   :  { %v832_v25 = vsub.f32 %v828_v20, %v831_v24 }
 0x89a   :  { %v833_v26 = vmul.f32 %v832_v25, %v832_v25 }
 0x89c   :  { %834 = vadd.xlane.f32.xlu1 %v833_v26 }
 0x929   :  { %v835_v6 = vpop.xlane.xlu1 %834 }
 0x92a   :  { %v836_v49 = vmul.f32 0.007874016, %v835_v6 }
 0x92c   :  { %1372 = vrsqrt.f32 %v836_v49  ;;  %vm839_vm10 = vcmp.eq.f32.partialorder %v836_v49, inf  ;;  %v842_v51 = vand.u32 2147483648, %v836_v49  ;;  %vm841_vm11 = vcmp.eq.f32.partialorder %v836_v49, 0.0 }
 0x936   :  { %v1373_v21 = vpop.eup %1372 }
 0x937   :  { %v838_v50 = vmul.f32 %v1373_v21, %v836_v49 }
 0x939   :  { %v840_v52 = vsel %vm839_vm10, %v836_v49, %v838_v50 }
 0x93a   :  { %v843_v53 = vsel %vm841_vm11, %v842_v51, %v840_v52 }
 0x93b   :  { %v844_v54 = vadd.f32 1e-06, %v843_v53 }
 0x93d   :  { %1374 = vrcp.f32 %v844_v54 }
 0x947   :  { %v1375_v55 = vpop.eup %1374 }
 0x948   :  { %v846_v57 = vmul.f32 %v1375_v55, %v832_v25 }
 0x94a   :  { %v847_v59 = vmul.f32 %v846_v57, %v128_v56 }
 0x94c   :  { %v848_v60 = vadd.f32 %v847_v59, %v129_v58 }
 0x94e   :  { %1150 = vmatmul.mubr.f32.vlgmr.msra.gmra.mrb[2].mxu0 %v848_v60 }
 0xa21   :  { %v931_v61 = vpop.f32.mrb[2].mxu0 }
 0xa22   :  { %v932_v62 = vadd.f32 %v931_v61, %v130_v18  ;;  %v1151_v63 = vpop.f32.mrb[3].mxu0 }
 0xa24   :  { %936 = vst.msk [vmem:[%s1832_s9] sm:$0xff] %vm935_vm12, %v932_v62 }
 0xa25   :  { %941 = vsyncpa [#allocation3], 1 }
 0xa26   :  { %942 = vsyncpa [#allocation5], 1 }
 0xa27   :  { %943 = vsyncpa [#allocation8], 1 }
 0xa28   :  { %944 = vsyncpa [#allocation11], 1 }

</bundles_post_ra>
